<compile_context>
chip_gen: v5e
topology: v5e:2x2
jax: 0.10.0
libtpu: 0.0.40
codegen_flags: <defaults>
</compile_context>

<pallas_src>
import math

import jax
import jax.numpy as jnp
from jax.experimental import pallas as pl
from jax.experimental.pallas import tpu as pltpu

_TARGET_TILE_BYTES = 2 * 1024 * 1024   # ~2 MiB per buffer; 2-in + 2-out ~= 8 MiB VMEM
_VMEM_LIMIT_BYTES = 32 * 1024 * 1024   # explicit ceiling; safe on v5e/v6e/v7x
_LANE_CHOICES = (1024, 512, 256, 128)  # widest lane-dense slab that divides the total


def _sublane_multiple(dtype) -> int:
    """Packed-sublane multiple: 8 for 4-byte, 16 for 2-byte, 32 for 1-byte dtypes."""
    return max(8, 32 // max(jnp.dtype(dtype).itemsize, 1))


def _identity_tile_kernel(x_ref, o_ref):
    # Pure pass-through of one (tile_rows, lanes) tile -- the only "compute"
    # the stub forward could legally perform on x before returning None.
    o_ref[...] = x_ref[...]


def _dma_identity_kernel(x_hbm, o_hbm, sem):
    # Single whole-array HBM->HBM DMA: no VMEM staging, no per-tile pipeline
    # overhead, works for any (ragged) shape with zero padding.
    cp = pltpu.make_async_copy(x_hbm, o_hbm, sem)
    cp.start()
    cp.wait()


def _tiled_lane_dense_copy(x: jax.Array) -> jax.Array:
    """Lane-dense tiled identity copy (requires x.size % 128 == 0)."""
    shape = x.shape
    total = math.prod(shape)
    dtype = x.dtype
    itemsize = jnp.dtype(dtype).itemsize
    sub = _sublane_multiple(dtype)

    lanes = next(l for l in _LANE_CHOICES if total % l == 0)
    rows = total // lanes

    # ~2 MiB per buffer, rounded down to the dtype's packed-sublane multiple.
    tile_rows = max(sub, (_TARGET_TILE_BYTES // (lanes * itemsize)) // sub * sub)
    if rows <= tile_rows:
        tile_rows = rows  # single full-extent block (bypasses the (8,128) rule)
    num_tiles = pl.cdiv(rows, tile_rows)

    # Contiguous collapse to 2-D: metadata-only, no extra HBM pass, no padding.
    x2d = jnp.reshape(x, (rows, lanes))

    out2d = pl.pallas_call(
        _identity_tile_kernel,
        out_shape=jax.ShapeDtypeStruct((rows, lanes), dtype),
        grid_spec=pltpu.PrefetchScalarGridSpec(
            num_scalar_prefetch=0,
            grid=(num_tiles,),
            in_specs=[pl.BlockSpec((tile_rows, lanes), lambda i: (i, 0))],
            out_specs=pl.BlockSpec((tile_rows, lanes), lambda i: (i, 0)),
        ),
        compiler_params=pltpu.CompilerParams(
            dimension_semantics=("parallel",),   # megacore sharding on v7x
            vmem_limit_bytes=_VMEM_LIMIT_BYTES,
        ),
        cost_estimate=pl.CostEstimate(
            flops=0, transcendentals=0, bytes_accessed=2 * total * itemsize),
    )(x2d)

    return jnp.reshape(out2d, shape)


def _dma_copy(x: jax.Array) -> jax.Array:
    """Whole-array HBM->HBM DMA identity for shapes whose size isn't 128-divisible."""
    total = math.prod(x.shape)
    return pl.pallas_call(
        _dma_identity_kernel,
        out_shape=jax.ShapeDtypeStruct(x.shape, x.dtype),
        in_specs=[pl.BlockSpec(memory_space=pl.ANY)],
        out_specs=pl.BlockSpec(memory_space=pl.ANY),
        scratch_shapes=[pltpu.SemaphoreType.DMA],
        cost_estimate=pl.CostEstimate(
            flops=0, transcendentals=0,
            bytes_accessed=2 * total * jnp.dtype(x.dtype).itemsize),
    )(x)


def _pallas_passthrough(x: jax.Array) -> jax.Array:
    """Runs x through a Pallas identity data path; returns x unchanged.

    NOT on the production forward path (D.forward is `pass`); kept for
    exercising / validating the device data path.
    """
    total = math.prod(x.shape)
    if total == 0:
        return x
    if total % 128 == 0:
        return _tiled_lane_dense_copy(x)
    return _dma_copy(x)


def d_forward(x_nchw: jax.Array, *, exercise_kernel: bool = False):
    """Matches PyTorch D.forward semantics exactly: returns None.

    Production path does zero device work (the PyTorch forward is `pass`).
    Set exercise_kernel=True only for debugging/validation; the returned value
    is still None to match the reference exactly.
    """
    if exercise_kernel:
        _ = _pallas_passthrough(x_nchw)
    return None  # PyTorch forward is `pass`


if __name__ == "__main__":
    key = jax.random.PRNGKey(0)
    # Small NCHW input consistent with a GAN discriminator's expected input.
    x = jax.random.normal(key, (2, 4, 16, 16), dtype=jnp.float32)

    # Lane-dense tiled path (total % 128 == 0).  Test-only; not the hot path.
    y = _pallas_passthrough(x)
    jax.block_until_ready(y)
    assert y.shape == x.shape and y.dtype == x.dtype
    assert bool(jnp.all(y == x))

    # Ragged-shape path (total % 128 != 0) -> single HBM->HBM DMA identity.
    xr = jax.random.normal(jax.random.PRNGKey(0), (3, 5, 7), dtype=jnp.float32)
    yr = _pallas_passthrough(xr)
    jax.block_until_ready(yr)
    assert yr.shape == xr.shape and yr.dtype == xr.dtype
    assert bool(jnp.all(yr == xr))

    # Exact semantic match with the PyTorch module: forward returns None and
    # performs no device work.
    result = d_forward(x)
    assert result is None

    print("KERNEL_OK")
</pallas_src>

<mosaic_0001>
module attributes {stable_mosaic.version = 11 : i64} {
  func.func @_identity_tile_kernel(%arg0: i32, %arg1: memref<2x1024xf32, #tpu.memory_space<vmem>>, %arg2: memref<2x1024xf32, #tpu.memory_space<vmem>>) attributes {dimension_semantics = [#tpu.dimension_semantics<parallel>], iteration_bounds = array<i64: 1>, scalar_prefetch = 0 : i64, scratch_operands = 0 : i64, tpu.core_type = #tpu.core_type<tc>, window_params = [{transform_indices = @transform_0, window_bounds = array<i64: 2, 1024>}, {transform_indices = @transform_1, window_bounds = array<i64: 2, 1024>}]} {
    %c0 = arith.constant 0 : index
    %c0_0 = arith.constant 0 : index
    %0 = vector.load %arg1[%c0, %c0_0] : memref<2x1024xf32, #tpu.memory_space<vmem>>, vector<2x1024xf32>
    %c0_1 = arith.constant 0 : index
    %c0_2 = arith.constant 0 : index
    %1 = vector.load %arg2[%c0_1, %c0_2] : memref<2x1024xf32, #tpu.memory_space<vmem>>, vector<2x1024xf32>
    tpu.vector_store %arg2[%c0_1, %c0_2], %0 {strides = array<i32>} : memref<2x1024xf32, #tpu.memory_space<vmem>>, vector<2x1024xf32>,
    return
  }
  func.func @transform_0(%arg0: i32) -> (i32, i32) {
    %c0_i32 = arith.constant 0 : i32
    %c0_i32_0 = arith.constant 0 : i32
    return %arg0, %c0_i32 : i32, i32
  }
  func.func @transform_1(%arg0: i32) -> (i32, i32) {
    %c0_i32 = arith.constant 0 : i32
    %c0_i32_0 = arith.constant 0 : i32
    return %arg0, %c0_i32 : i32, i32
  }
}

</mosaic_0001>

<bundles_post_ra>
// kernel: tpu_custom_call.1
= control target key start
LH: loop header
LB: loop body
LE: loop exit
PB: predicated region body
PF: predicated region fallthrough
CT: control target
= control target key end

     0   :  { %6 = vsyncpa [#allocation3], 0  ;;  %s116_s0 = inlined_call_operand.hbm [shape: f32[2,1024], index: 0, kind: input, shape index: {}]   ;;  %s117_s1 = inlined_call_operand.hbm [shape: f32[2,1024], index: 1, kind: output, shape index: {}]  }
   0x1   :  { %7 = vsyncpa [#allocation4], 0  ;;  %s13_s8 = sshll.u32 %s116_s0, 4  ;;  %s98_s9 = smov [#allocation2]   ;;  %s14_s8 = int_to_ptr.hbm [resolvable:$true] %s13_s8 }
   0x2   :  { %s15_s10 = sshll.u32 %s98_s9, 4  ;;  %s16_s10 = int_to_ptr.vmem [resolvable:$true] %s15_s10 }
   0x3   :  { %18 = dma.hbm_to_vmem [thread:$0]  %s14_s8, 256, %s16_s10, [#allocation3]  }
   0x4   :  { %94 = dma.done.wait [#allocation3], 256  }
   0x5   :  { %95 = vsyncadd [#allocation3], 4294967040  ;;  %s99_s11 = smov [#allocation5]   ;;  %s34_s15 = sshll.u32 %s117_s1, 4  ;;  %v23_v0 = vld [vmem:[#allocation2] sm:$0xff]  ;;  %v24_v1 = vld [vmem:[#allocation2 + $0x8] sm:$0xff]  ;;  %s35_s15 = int_to_ptr.hbm [resolvable:$true] %s34_s15 }
   0x6   :  { %s32_s12 = sshll.u32 %s99_s11, 4  ;;  %25 = vst [vmem:[#allocation5] sm:$0xff] %v23_v0  ;;  %s33_s12 = int_to_ptr.vmem [resolvable:$true] %s32_s12 }
   0x7   :  { %26 = vst [vmem:[#allocation5 + $0x8] sm:$0xff] %v24_v1 }
   0x8   :  { %37 = dma.vmem_to_hbm [thread:$0]  %s33_s12, 256, %s35_s15, [#allocation4]  }
   0x9   :  { %96 = dma.done.wait [#allocation4], 256  }
   0xa   :  { %97 = vsyncadd [#allocation4], 4294967040 }
   0xb   :  { %42 = vsyncpa [#allocation3], 1 }
   0xc   :  { %43 = vsyncpa [#allocation4], 1 }

</bundles_post_ra>
